<compile_context>
chip_gen: v7x
topology: tpu7x:2x2x1
jax: 0.10.0
libtpu: 0.0.40
codegen_flags: <defaults>
</compile_context>

<pallas_src>
import functools

import jax
import jax.numpy as jnp
from jax import lax
from jax.experimental import pallas as pl
from jax.experimental.pallas import tpu as pltpu


# ---------------------------------------------------------------------------
# Tiling constants / helpers
# ---------------------------------------------------------------------------

def _pick_vmem_limit():
    # v7x has 64 MiB physical VMEM per TC -> keep a conservative 32 MiB scoped
    # limit there; v5e/v6e (128 MiB physical) can take 64 MiB.
    try:
        info = pltpu.get_tpu_info()
        cap = getattr(info, "vmem_capacity_bytes", 0)
        if cap and cap >= 100 * 1024 * 1024:
            return 64 * 1024 * 1024
    except Exception:
        pass
    return 32 * 1024 * 1024


VMEM_LIMIT = _pick_vmem_limit()
# Bigger k tiles amortise the ~0.35us per-grid-step overhead when VMEM allows.
TK = 1024 if VMEM_LIMIT >= 64 * 1024 * 1024 else 512


def _round_up(v, m):
    return ((v + m - 1) // m) * m


def _row_tile(B):
    # second-to-last block dim must be a multiple of 8 or the full dim
    for t in (128, 64, 32, 16, 8):
        if B % t == 0:
            return t
    return B


def _mosaic_params(dim_sem):
    return pltpu.CompilerParams(dimension_semantics=dim_sem,
                                vmem_limit_bytes=VMEM_LIMIT)


# ---------------------------------------------------------------------------
# Pallas kernels
# ---------------------------------------------------------------------------

def _masked_fwd_kernel(a_ref, m_ref, w_ref, bias_ref, o_ref, acc_ref):
    # logits = (a * m) @ W + bias  ;  accumulator initialised with the bias.
    k = pl.program_id(1)

    @pl.when(k == 0)
    def _():
        acc_ref[...] = bias_ref[...]

    prod = (a_ref[...] * m_ref[...].astype(jnp.float32)).astype(jnp.bfloat16)
    acc_ref[...] += jnp.dot(prod, w_ref[...], preferred_element_type=jnp.float32)

    @pl.when(k == pl.num_programs(1) - 1)
    def _():
        o_ref[...] = acc_ref[...]


def masked_forward(a_f32, m_bf, W_bf, bias_f32):
    """(a * m) @ W + bias.  a:(Bp,Dp) f32, m:(Bp,Dp) bf16 (0/1), W:(Dp,Np) bf16,
    bias:(Bp,Np) f32.  Used for bias_eff / initial / final / clean logits."""
    Bp, Dp = a_f32.shape
    Np = W_bf.shape[1]
    tm, tk = _row_tile(Bp), TK
    grid = (Bp // tm, Dp // tk)
    return pl.pallas_call(
        _masked_fwd_kernel,
        out_shape=jax.ShapeDtypeStruct((Bp, Np), jnp.float32),
        grid=grid,
        in_specs=[
            pl.BlockSpec((tm, tk), lambda m, k: (m, k)),   # a (f32)
            pl.BlockSpec((tm, tk), lambda m, k: (m, k)),   # mask (bf16)
            pl.BlockSpec((tk, Np), lambda m, k: (k, 0)),   # W (bf16)
            pl.BlockSpec((tm, Np), lambda m, k: (m, 0)),   # bias (f32)
        ],
        out_specs=pl.BlockSpec((tm, Np), lambda m, k: (m, 0)),
        scratch_shapes=[pltpu.VMEM((tm, Np), jnp.float32)],
        compiler_params=_mosaic_params(("parallel", "arbitrary")),
    )(a_f32, m_bf, W_bf, bias_f32)


def _step_kernel(step_ref, p_ref, pold_ref, g_ref, wt_ref, m_ref, w_ref,
                 bias_ref, np_ref, o_ref, acc_ref, *, is_first):
    # Fused per k-tile:
    #   grad tile      = mask * (dL/dlogits @ W^T)        (backward, fused)
    #   APGD update    = sign/momentum/clamp on the patch tile
    #   forward matmul = (mask * new_patch) @ W accumulated into bias_eff.
    k = pl.program_id(1)

    @pl.when(k == 0)
    def _():
        acc_ref[...] = bias_ref[...]       # bias_eff = ((1-mask)*x) @ W + b

    g_tile = jnp.dot(g_ref[...], wt_ref[...], preferred_element_type=jnp.float32)
    m = m_ref[...].astype(jnp.float32)
    p = p_ref[...]
    z = jnp.clip(p + step_ref[...] * (m * jnp.sign(g_tile)), 0.0, 1.0)
    if is_first:
        new_p = z
    else:
        new_p = jnp.clip(p + 0.75 * (z - p) + 0.25 * (p - pold_ref[...]),
                         0.0, 1.0)
    np_ref[...] = new_p

    acc_ref[...] += jnp.dot((new_p * m).astype(jnp.bfloat16), w_ref[...],
                            preferred_element_type=jnp.float32)

    @pl.when(k == pl.num_programs(1) - 1)
    def _():
        o_ref[...] = acc_ref[...]


def apgd_step(step, patch, patch_old, g_bf, W_T_bf, mask_bf, W_bf, bias_eff,
              *, is_first):
    Bp, Dp = patch.shape
    Np = W_bf.shape[1]
    tm, tk = _row_tile(Bp), TK
    grid = (Bp // tm, Dp // tk)
    kern = functools.partial(_step_kernel, is_first=is_first)
    # TODO(synk): skip mask-inactive k tiles via PrefetchScalarGridSpec
    # (per-m-tile active-tile lists); needs a static per-tile bound on active
    # k tiles — large win for ImageNet-scale images.
    # TODO(synk): for v7x (2 TCs) with B <= tm, split Np into n tiles to get a
    # second 'parallel' grid axis; the grad matmul would then be recomputed per
    # n tile, so it is only worthwhile for large Np.
    # TODO(synk): for B >> tm, reorder to (k outer, m inner) with a (B, Np)
    # accumulator so W / W^T are streamed once per step instead of per m tile.
    return pl.pallas_call(
        kern,
        out_shape=(jax.ShapeDtypeStruct((Bp, Dp), jnp.float32),   # new patch
                   jax.ShapeDtypeStruct((Bp, Np), jnp.float32)),  # logits (pad)
        grid=grid,
        in_specs=[
            pl.BlockSpec((tm, 1), lambda m, k: (m, 0)),    # step size (B,1) f32
            pl.BlockSpec((tm, tk), lambda m, k: (m, k)),   # patch f32
            pl.BlockSpec((tm, tk), lambda m, k: (m, k)),   # patch_old f32
            pl.BlockSpec((tm, Np), lambda m, k: (m, 0)),   # g_logits bf16
            pl.BlockSpec((Np, tk), lambda m, k: (0, k)),   # W^T bf16
            pl.BlockSpec((tm, tk), lambda m, k: (m, k)),   # mask bf16
            pl.BlockSpec((tk, Np), lambda m, k: (k, 0)),   # W bf16
            pl.BlockSpec((tm, Np), lambda m, k: (m, 0)),   # bias_eff f32
        ],
        out_specs=(pl.BlockSpec((tm, tk), lambda m, k: (m, k)),
                   pl.BlockSpec((tm, Np), lambda m, k: (m, 0))),
        scratch_shapes=[pltpu.VMEM((tm, Np), jnp.float32)],
        compiler_params=_mosaic_params(("parallel", "arbitrary")),
    )(step, patch, patch_old, g_bf, W_T_bf, mask_bf, W_bf, bias_eff)


def _composite_kernel(m_ref, p_ref, x_ref, o_ref):
    o_ref[...] = jnp.where(m_ref[...].astype(jnp.float32) > 0.5,
                           p_ref[...], x_ref[...])


def composite(mask_bf, patch_f32, x_f32):
    Bp, Dp = x_f32.shape
    tm, tk = _row_tile(Bp), TK
    grid = (Bp // tm, Dp // tk)
    return pl.pallas_call(
        _composite_kernel,
        out_shape=jax.ShapeDtypeStruct((Bp, Dp), jnp.float32),
        grid=grid,
        in_specs=[pl.BlockSpec((tm, tk), lambda m, d: (m, d))] * 3,
        out_specs=pl.BlockSpec((tm, tk), lambda m, d: (m, d)),
        compiler_params=_mosaic_params(("parallel", "parallel")),
    )(mask_bf, patch_f32, x_f32)


# ---------------------------------------------------------------------------
# Small plain-JAX glue (tiny (B, num_classes) tensors / setup)
# ---------------------------------------------------------------------------

def dlr_untargeted_loss(logits, y):
    x_s = jnp.sort(logits, axis=1)
    ind = (jnp.argmax(logits, axis=1) == y).astype(logits.dtype)
    zy = jnp.take_along_axis(logits, y[:, None], axis=1)[:, 0]
    return -(zy - ind * x_s[:, -2] - (1.0 - ind) * x_s[:, -1]) / (
        x_s[:, -1] - x_s[:, -3] + 1e-12)


def cross_entropy_loss(logits, y):
    logp = jax.nn.log_softmax(logits, axis=1)
    return -jnp.take_along_axis(logp, y[:, None], axis=1)[:, 0]


def get_random_mask(key, B, img_size, patch_size, grid_aligned):
    # Matches torch.randint's exclusive-high semantics (grid_aligned samples
    # [0, img_size // patch_size - 2], same as the PyTorch reference).
    kh, kw = jax.random.split(key)
    if grid_aligned:
        h_idx = jax.random.randint(kh, (B,), 0, img_size // patch_size - 1) * patch_size
        w_idx = jax.random.randint(kw, (B,), 0, img_size // patch_size - 1) * patch_size
    else:
        h_idx = jax.random.randint(kh, (B,), 0, img_size - patch_size)
        w_idx = jax.random.randint(kw, (B,), 0, img_size - patch_size)
    hh = jnp.arange(img_size)
    ww = jnp.arange(img_size)
    mh = (hh[None, :] >= h_idx[:, None]) & (hh[None, :] < h_idx[:, None] + patch_size)
    mw = (ww[None, :] >= w_idx[:, None]) & (ww[None, :] < w_idx[:, None] + patch_size)
    mask = mh[:, None, :, None] & mw[:, None, None, :]          # (B, 1, H, W) bool
    return mask


# ---------------------------------------------------------------------------
# PatchAutoPGD
# ---------------------------------------------------------------------------

class PatchAutoPGD:
    def __init__(self, W, b, patch_size, img_size, num_steps, num_restarts,
                 grid_aligned, loss='dlr', num_eot_steps=1, rho=0.75, verbose=False):
        # model = linear classifier: logits = flatten(img) @ W + b
        assert num_eot_steps >= 1
        assert num_steps >= 1
        self.D, self.NC = W.shape
        # Pad D to a multiple of the lane tile, NC to a multiple of 128 so all
        # kernel operands / outputs are lane-dense.
        self.Dp = _round_up(max(self.D, TK), TK)
        self.Np = _round_up(max(self.NC, 128), 128)
        # TODO(synk): single-N-tile design; N-tiling needed beyond this.
        assert self.Np <= 2048, "pad-to-128 class dim must fit a single N tile"

        W_p = jnp.pad(W.astype(jnp.float32),
                      ((0, self.Dp - self.D), (0, self.Np - self.NC)))
        self.W_pad = W_p.astype(jnp.bfloat16)            # (Dp, Np) bf16
        self.W_T = W_p.T.astype(jnp.bfloat16)            # (Np, Dp) bf16, pre-transposed
        self.b_pad = jnp.pad(b.astype(jnp.float32),
                             ((0, 0), (0, self.Np - self.NC)))   # (1, Np)

        self.patch_size = patch_size
        self.img_size = img_size
        self.num_steps = num_steps
        self.num_restarts = num_restarts
        self.grid_aligned = grid_aligned
        self.loss = loss
        self.num_eot_steps = num_eot_steps
        self.rho = rho
        self.verbose = verbose

        p_step = max(int(0.22 * self.num_steps), 1)
        p_decr = max(int(0.03 * self.num_steps), 1)
        p_min = max(int(0.06 * self.num_steps), 1)
        checkpoints = [0]
        while checkpoints[-1] + p_step < self.num_steps:
            checkpoints.append(checkpoints[-1] + p_step)
            p_step = max(p_step - p_decr, p_min)
        self.checkpoints = checkpoints

        # Per-step checkpoint tables so the step loop can be a lax.fori_loop.
        is_cp = [False] * self.num_steps
        prev_k = [0] * self.num_steps
        for idx, c in enumerate(checkpoints):
            is_cp[c] = True
            # idx == 0 wraps to checkpoints[-1]: same (benign) quirk as the
            # PyTorch reference -> condition1 is all-False at i == 0 when there
            # are >= 2 checkpoints.
            prev_k[c] = checkpoints[idx - 1]
        self._is_cp = jnp.asarray(is_cp, dtype=jnp.bool_)
        self._prev_k = jnp.asarray(prev_k, dtype=jnp.int32)

        # jit the whole perturb(): Pallas kernels + tiny glue fuse into one
        # XLA program; compiles once (full-batch + active-row mask).
        self._perturb_jit = jax.jit(self._perturb_impl)

    # --- criterion (tiny tensors, plain JAX; grad via jax.vjp) ---
    def _criterion(self, logits, y):
        if self.loss == 'ce':
            return cross_entropy_loss(logits, y)
        elif self.loss == 'dlr':
            return dlr_untargeted_loss(logits, y)
        raise ValueError('Unknown loss')

    def clean_logits(self, x):
        B = x.shape[0]
        Bp = _round_up(max(B, 8), 8)
        x_p = jnp.pad(x.reshape(B, self.D).astype(jnp.float32),
                      ((0, Bp - B), (0, self.Dp - self.D)))
        ones_m = jnp.ones((Bp, self.Dp), jnp.bfloat16)
        bias_b = jnp.broadcast_to(self.b_pad, (Bp, self.Np)).astype(jnp.float32)
        logits = masked_forward(x_p, ones_m, self.W_pad, bias_b)
        return logits[:B, :self.NC]

    # --- one full restart (jitted; full batch + active-row mask) ---
    def _perturb_impl(self, x, y, active, key):
        B, C = x.shape[0], x.shape[1]
        D, Dp, Np, NC = self.D, self.Dp, self.Np, self.NC
        Bp = _round_up(max(B, 8), 8)
        pad_rows = Bp - B
        num_steps, rho = self.num_steps, self.rho
        is_cp_arr, prev_k_arr = self._is_cp, self._prev_k

        kmask, kpatch = jax.random.split(key)
        mask_b1hw = get_random_mask(kmask, Bp, self.img_size, self.patch_size,
                                    self.grid_aligned)
        mask_flat = jnp.broadcast_to(
            mask_b1hw, (Bp, C, self.img_size, self.img_size)).reshape(Bp, D)
        mask_bf = jnp.pad(mask_flat.astype(jnp.bfloat16),
                          ((0, 0), (0, Dp - D)))                  # (Bp, Dp)
        notmask_bf = jnp.pad((~mask_flat).astype(jnp.bfloat16),
                             ((0, 0), (0, Dp - D)))

        x_p = jnp.pad(x.reshape(B, D).astype(jnp.float32),
                      ((0, pad_rows), (0, Dp - D)))               # (Bp, Dp) f32
        y_p = jnp.pad(y, ((0, pad_rows),))
        act_p = jnp.pad(active, ((0, pad_rows),))                 # pads: False
        bias_b = jnp.broadcast_to(self.b_pad, (Bp, Np)).astype(jnp.float32)

        # bias_eff = ((1 - mask) * x) @ W + b : computed once; the hot loop
        # never streams x again.
        bias_eff = masked_forward(x_p, notmask_bf, self.W_pad, bias_b)

        patch = jax.random.uniform(kpatch, (Bp, Dp), jnp.float32)
        patch_old = patch
        patch_best = patch
        step_size = 2.0 * jnp.ones((Bp, 1), jnp.float32)
        loss_best = jnp.full((Bp,), -jnp.inf, jnp.float32)
        loss_checkpoint = loss_best
        plateaued_checkpoint = jnp.ones((Bp,), dtype=bool)
        loss_log = jnp.zeros((num_steps, Bp), jnp.float32)
        done = jnp.zeros((), dtype=bool)   # reference "break" as on-device flag

        def loss_and_glogits(logits_pad):
            logits = logits_pad[:, :NC]
            loss, vjp_fn = jax.vjp(lambda l: self._criterion(l, y_p), logits)
            (g_logits,) = vjp_fn(jnp.ones_like(loss))
            # TODO(synk): num_eot_steps > 1 is a no-op for this deterministic
            # linear model (identical logits/grad per EOT draw), so the extra
            # EOT forwards are skipped; the /num_eot_steps average is exact.
            g_pad = jnp.pad(g_logits, ((0, 0), (0, Np - NC)))
            return logits, loss, g_pad

        # ---- initial gradient at the random patch (reference pre-loop block) ----
        logits0 = masked_forward(patch, mask_bf, self.W_pad, bias_eff)
        _, _, g_log = loss_and_glogits(logits0)
        g_best = g_log    # grad is a fixed linear fn of g_logits; carry only g.

        def run_step(i, carry, is_first):
            (patch, patch_old, g_log, step_size, loss_best, loss_cp, plat_cp,
             loss_log, patch_best, g_best, done) = carry

            new_patch, logits_pad = apgd_step(
                step_size, patch, patch_old, g_log.astype(jnp.bfloat16),
                self.W_T, mask_bf, self.W_pad, bias_eff, is_first=is_first)
            logits, loss, g_new = loss_and_glogits(logits_pad)

            patch_old = patch
            patch = new_patch
            g_log = g_new

            # early-break condition only looks at active (non-padded) rows
            fooled_row = jnp.logical_or(jnp.argmax(logits, axis=1) != y_p,
                                        jnp.logical_not(act_p))
            fooled_all = jnp.all(fooled_row)
            patch_best = jnp.where(fooled_all, patch, patch_best)

            book = jnp.logical_not(fooled_all)
            loss_log = loss_log.at[i].set(jnp.where(book, loss, loss_log[i]))
            improved = jnp.logical_and(book, loss > loss_best)
            patch_best = jnp.where(improved[:, None], patch, patch_best)
            loss_best = jnp.where(improved, loss, loss_best)
            g_best = jnp.where(improved[:, None], g_log, g_best)

            # checkpoint block (vectorised check_condition1, dynamic bounds)
            is_cp = is_cp_arr[i]
            k_prev = prev_k_arr[i]
            inc = (loss_log[1:] > loss_log[:-1]).astype(jnp.float32)
            jidx = jnp.arange(num_steps - 1)
            valid = jnp.logical_and(jidx >= k_prev, jidx < i).astype(jnp.float32)
            t = jnp.sum(inc * valid[:, None], axis=0)
            cond1 = t <= (i - k_prev).astype(jnp.float32) * rho
            cond2 = jnp.logical_and(jnp.logical_not(plat_cp), loss_cp >= loss)
            plateaued = jnp.logical_or(cond1, cond2)
            do_cp = jnp.logical_and(is_cp, book)
            loss_cp = jnp.where(do_cp, loss_best, loss_cp)
            plat_cp = jnp.where(do_cp, plateaued, plat_cp)
            plat_act = jnp.logical_and(do_cp, plateaued)
            step_size = jnp.where(plat_act[:, None], step_size * 0.5, step_size)
            patch = jnp.where(plat_act[:, None], patch_best, patch)
            g_log = jnp.where(plat_act[:, None], g_best, g_log)

            done = jnp.logical_or(done, fooled_all)
            return (patch, patch_old, g_log, step_size, loss_best, loss_cp,
                    plat_cp, loss_log, patch_best, g_best, done)

        carry = (patch, patch_old, g_log, step_size, loss_best, loss_checkpoint,
                 plateaued_checkpoint, loss_log, patch_best, g_best, done)

        # step 0 peeled (is_first update formula); remaining steps in fori_loop
        # with a lax.cond skip once all active rows are fooled (the reference
        # "break"), so post-break steps execute no kernels.
        carry = run_step(0, carry, True)

        def body(i, c):
            return lax.cond(c[-1], lambda cc: cc,
                            lambda cc: run_step(i, cc, False), c)

        carry = lax.fori_loop(1, num_steps, body, carry)

        (patch, patch_old, g_log, step_size, loss_best, loss_cp, plat_cp,
         loss_log, patch_best, g_best, done) = carry

        logits_f = masked_forward(patch_best, mask_bf, self.W_pad, bias_eff)
        fooled = jnp.argmax(logits_f[:, :NC], axis=1) != y_p
        patch_best_img = patch_best[:B, :D].reshape(x.shape)
        return patch_best_img, fooled[:B], mask_b1hw[:B]

    def __call__(self, x, y, key):
        B = x.shape[0]
        D, Dp = self.D, self.Dp

        correct = jnp.argmax(self.clean_logits(x), axis=1) == y

        kpatch, krest = jax.random.split(key)
        patch = jax.random.uniform(kpatch, x.shape, jnp.float32)
        mask = jnp.zeros((B, 1, self.img_size, self.img_size), dtype=bool)

        # Full-batch perturb with an `active` row mask: compiles once across
        # restarts; the num_restarts early break stays as a cheap host sync.
        for i in range(self.num_restarts):
            if int(jnp.sum(correct)) == 0:
                break
            krest, kr = jax.random.split(krest)
            patch_i, fooled_i, mask_i = self._perturb_jit(x, y, correct, kr)
            newly = jnp.logical_and(correct, fooled_i)
            upd = correct if i == 0 else newly
            patch = jnp.where(upd[:, None, None, None], patch_i, patch)
            mask = jnp.where(upd[:, None, None, None], mask_i, mask)
            correct = jnp.logical_and(correct, jnp.logical_not(fooled_i))

        # final composite: where(mask, patch, x)
        Bp = _round_up(max(B, 8), 8)
        mask_flat = jnp.broadcast_to(mask, x.shape).reshape(B, D)
        mask_p = jnp.pad(mask_flat.astype(jnp.bfloat16),
                         ((0, Bp - B), (0, Dp - D)))
        patch_p = jnp.pad(patch.reshape(B, D).astype(jnp.float32),
                          ((0, Bp - B), (0, Dp - D)))
        x_p = jnp.pad(x.reshape(B, D).astype(jnp.float32),
                      ((0, Bp - B), (0, Dp - D)))
        out_p = composite(mask_p, patch_p, x_p)
        return out_p[:B, :D].reshape(x.shape)


# ---------------------------------------------------------------------------
# main
# ---------------------------------------------------------------------------

if __name__ == "__main__":
    B, C, H, Wimg = 2, 4, 16, 16
    NUM_CLASSES = 16
    D = C * H * Wimg

    key = jax.random.PRNGKey(0)
    kx, kw, krun = jax.random.split(key, 3)

    x = jax.random.uniform(kx, (B, C, H, Wimg), jnp.float32)
    # deterministic synthetic "model" parameters
    Wm = 0.05 * jax.random.normal(kw, (D, NUM_CLASSES), jnp.float32)
    bm = jnp.zeros((1, NUM_CLASSES), jnp.float32)

    attack = PatchAutoPGD(Wm, bm, patch_size=4, img_size=16, num_steps=5,
                          num_restarts=1, grid_aligned=True, loss='dlr',
                          num_eot_steps=1, rho=0.75, verbose=False)

    # labels = clean predictions so the attack actually runs its perturb loop
    y = jnp.argmax(attack.clean_logits(x), axis=1)

    out = attack(x, y, krun)
    out = jax.block_until_ready(out)
    assert out.shape == x.shape and out.dtype == jnp.float32
    print("KERNEL_OK")
</pallas_src>

<mosaic_0001>
module attributes {stable_mosaic.version = 11 : i64} {
  func.func @_masked_fwd_kernel(%arg0: i32, %arg1: i32, %arg2: memref<8x512xf32, #tpu.memory_space<vmem>>, %arg3: memref<8x512xbf16, #tpu.memory_space<vmem>>, %arg4: memref<512x128xbf16, #tpu.memory_space<vmem>>, %arg5: memref<8x128xf32, #tpu.memory_space<vmem>>, %arg6: memref<8x128xf32, #tpu.memory_space<vmem>>, %arg7: memref<8x128xf32, #tpu.memory_space<vmem>>) attributes {dimension_semantics = [#tpu.dimension_semantics<parallel>, #tpu.dimension_semantics<arbitrary>], iteration_bounds = array<i64: 1, 2>, scalar_prefetch = 0 : i64, scratch_operands = 1 : i64, tpu.core_type = #tpu.core_type<tc>, window_params = [{transform_indices = @transform_0, window_bounds = array<i64: 8, 512>}, {transform_indices = @transform_1, window_bounds = array<i64: 8, 512>}, {transform_indices = @transform_2, window_bounds = array<i64: 512, 128>}, {transform_indices = @transform_3, window_bounds = array<i64: 8, 128>}, {transform_indices = @transform_4, window_bounds = array<i64: 8, 128>}]} {
    %c0_i32 = arith.constant 0 : i32
    %0 = arith.cmpi eq, %arg1, %c0_i32 : i32
    %1 = arith.extui %0 : i1 to i32
    %c0_i32_0 = arith.constant 0 : i32
    %2 = arith.cmpi ne, %1, %c0_i32_0 : i32
    scf.if %2 {
      %c0_11 = arith.constant 0 : index
      %c0_12 = arith.constant 0 : index
      %16 = vector.load %arg5[%c0_11, %c0_12] : memref<8x128xf32, #tpu.memory_space<vmem>>, vector<8x128xf32>
      %c0_13 = arith.constant 0 : index
      %c0_14 = arith.constant 0 : index
      %17 = vector.load %arg7[%c0_13, %c0_14] : memref<8x128xf32, #tpu.memory_space<vmem>>, vector<8x128xf32>
      tpu.vector_store %arg7[%c0_13, %c0_14], %16 {strides = array<i32>} : memref<8x128xf32, #tpu.memory_space<vmem>>, vector<8x128xf32>,
    } else {
    }
    %c0 = arith.constant 0 : index
    %c0_1 = arith.constant 0 : index
    %3 = vector.load %arg2[%c0, %c0_1] : memref<8x512xf32, #tpu.memory_space<vmem>>, vector<8x512xf32>
    %c0_2 = arith.constant 0 : index
    %c0_3 = arith.constant 0 : index
    %4 = vector.load %arg3[%c0_2, %c0_3] : memref<8x512xbf16, #tpu.memory_space<vmem>>, vector<8x512xbf16>
    %5 = arith.extf %4 : vector<8x512xbf16> to vector<8x512xf32>
    %6 = arith.mulf %3, %5 : vector<8x512xf32>
    %7 = arith.truncf %6 : vector<8x512xf32> to vector<8x512xbf16>
    %c0_4 = arith.constant 0 : index
    %c0_5 = arith.constant 0 : index
    %8 = vector.load %arg7[%c0_4, %c0_5] : memref<8x128xf32, #tpu.memory_space<vmem>>, vector<8x128xf32>
    %c0_6 = arith.constant 0 : index
    %c0_7 = arith.constant 0 : index
    %9 = vector.load %arg4[%c0_6, %c0_7] : memref<512x128xbf16, #tpu.memory_space<vmem>>, vector<512x128xbf16>
    %cst = arith.constant dense<0.000000e+00> : vector<8x128xf32>
    %10 = tpu.matmul %7, %9, %cst {dimension_numbers = #tpu.dot_dimension_numbers<[1], [0], [0], [1], [0, 0, 1, 1], [], []>} : vector<8x512xbf16>, vector<512x128xbf16>, vector<8x128xf32> -> vector<8x128xf32>
    %11 = arith.addf %8, %10 : vector<8x128xf32>
    %c0_8 = arith.constant 0 : index
    %c0_9 = arith.constant 0 : index
    %12 = vector.load %arg7[%c0_8, %c0_9] : memref<8x128xf32, #tpu.memory_space<vmem>>, vector<8x128xf32>
    tpu.vector_store %arg7[%c0_8, %c0_9], %11 {strides = array<i32>} : memref<8x128xf32, #tpu.memory_space<vmem>>, vector<8x128xf32>,
    %c1_i32 = arith.constant 1 : i32
    %13 = arith.cmpi eq, %arg1, %c1_i32 : i32
    %14 = arith.extui %13 : i1 to i32
    %c0_i32_10 = arith.constant 0 : i32
    %15 = arith.cmpi ne, %14, %c0_i32_10 : i32
    scf.if %15 {
      %c0_11 = arith.constant 0 : index
      %c0_12 = arith.constant 0 : index
      %16 = vector.load %arg7[%c0_11, %c0_12] : memref<8x128xf32, #tpu.memory_space<vmem>>, vector<8x128xf32>
      %c0_13 = arith.constant 0 : index
      %c0_14 = arith.constant 0 : index
      %17 = vector.load %arg6[%c0_13, %c0_14] : memref<8x128xf32, #tpu.memory_space<vmem>>, vector<8x128xf32>
      tpu.vector_store %arg6[%c0_13, %c0_14], %16 {strides = array<i32>} : memref<8x128xf32, #tpu.memory_space<vmem>>, vector<8x128xf32>,
    } else {
    }
    return
  }
  func.func @transform_0(%arg0: i32, %arg1: i32) -> (i32, i32) {
    %c0_i32 = arith.constant 0 : i32
    return %arg0, %arg1 : i32, i32
  }
  func.func @transform_1(%arg0: i32, %arg1: i32) -> (i32, i32) {
    %c0_i32 = arith.constant 0 : i32
    return %arg0, %arg1 : i32, i32
  }
  func.func @transform_2(%arg0: i32, %arg1: i32) -> (i32, i32) {
    %c0_i32 = arith.constant 0 : i32
    %c0_i32_0 = arith.constant 0 : i32
    return %arg1, %c0_i32 : i32, i32
  }
  func.func @transform_3(%arg0: i32, %arg1: i32) -> (i32, i32) {
    %c0_i32 = arith.constant 0 : i32
    %c0_i32_0 = arith.constant 0 : i32
    return %arg0, %c0_i32 : i32, i32
  }
  func.func @transform_4(%arg0: i32, %arg1: i32) -> (i32, i32) {
    %c0_i32 = arith.constant 0 : i32
    %c0_i32_0 = arith.constant 0 : i32
    return %arg0, %c0_i32 : i32, i32
  }
}

</mosaic_0001>

<bundles_post_ra>
// kernel: tpu_custom_call.1
= control target key start
LH: loop header
LB: loop body
LE: loop exit
PB: predicated region body
PF: predicated region fallthrough
CT: control target
= control target key end

     0   :  { %9 = vsyncpa [#allocation4], 0  ;;  %s1512_s0 = inlined_call_operand.hbm [shape: f32[8,1024], index: 0, kind: input, shape index: {}]   ;;  %s1513_s1 = inlined_call_operand.hbm [shape: bf16[8,1024], index: 1, kind: input, shape index: {}]   ;;  %s1514_s2 = inlined_call_operand.hbm [shape: bf16[1024,128], index: 2, kind: input, shape index: {}]   ;;  %s1515_s3 = inlined_call_operand.vmem [shape: f32[8,128], index: 3, kind: input, shape index: {}]   ;;  %s1516_s4 = inlined_call_operand.hbm [shape: f32[8,128], index: 4, kind: output, shape index: {}]  }
   0x1   :  { %11 = vsyncpa [#allocation4 + $0x1], 0 }
   0x2   :  { %12 = vsyncpa [#allocation7], 0 }
   0x3   :  { %14 = vsyncpa [#allocation7 + $0x1], 0 }
   0x4   :  { %15 = vsyncpa [#allocation5], 0  ;;  %s1241_s15 = smov 0   ;;  %s1243_s16 = smov 0  }
   0x5   :  { %s1245_s17 = smov 0   ;;  %s1247_s18 = smov 0  }
   0x6   :  { %s1249_s19 = smov 0   ;;  %s1251_s20 = smov 0  }
   0x7 LB: > { %s1270_s21 = sadd.s32 4294967295, %s1208_s20   ;;  %s30_s22 = sadd.s32 1, %s1204_s19  ;;  %s1208_s20 = sphi %s1251_s20, %s21_s20   ;;  %s1204_s19 = sphi %s1249_s19, %s1529_s19   ;;  %s1200_s18 = sphi %s1247_s18, %s1528_s18   ;;  %s1196_s17 = sphi %s1245_s17, %s1527_s17   ;;  %s1192_s16 = sphi %s1243_s16, %s1526_s16   ;;  %s1188_s15 = sphi %s1241_s15, %s1525_s15  }
   0x8   : > { %p31_p0 = scmp.ge.s32.totalorder %s30_s22, 2  ;;  %s42_s23 = sadd.s32 1, %s1196_s17 }
   0x9   : > { %p49_p1 = scmp.ne.s32.totalorder %s1196_s17, %s1192_s16  ;;  %p50_p2 = scmp.eq.s32.totalorder %s1208_s20, 0 }
   0xa   : > { %s1531_s22 = smov (%p31_p0, %s30_s22), 0  ;;  %p55_p4 = scmp.ne.s32.totalorder %s1192_s16, %s1188_s15 }
   0xb   : > { %p51_p3 = por %p50_p2, %p49_p1  ;;  %s38_s24 = ssub.s32 %s1204_s19, %s1531_s22 }
   0xc   : > { %p56_p5 = scmp.eq.s32.totalorder %s1270_s21, 0  ;;  %p40_p6 = scmp.eq.s32.totalorder %s38_s24, 0 }
   0xd   : > { %p948_p8 = scmp.lt.s32.totalorder %s1208_s20, 2  ;;  %s1292_s27 = sand.u32 1, %s1196_s17  }
   0xe   : > { %p1283_p7 = por %p56_p5, %p55_p4  ;;  %s213_s29 = sand.u32 1, %s1208_s20  }
   0xf   : > { %s1289_s26 = scalar_select %p40_p6, %s1196_s17, %s42_s23  }
  0x10   : > { %s1518_s25 = scalar_select %p1283_p7, 1, 0 }
  0x11   : > { %p1294_p9 = pnand %p948_p8, %p51_p3  ;;  %s833_s30 = sshll.u32 %s1292_s27, 4 }
  0x12   : > { %s882_s5 = sshll.u32 %s1204_s19, 8  ;;  %s217_s9 = scalar_lea.vmem [#allocation6], %s833_s30 }
  0x13   : > { %s1304_s8 = scalar_lea.hbm %s1513_s1, %s882_s5  ;;  %s227_s10 = sshll.u32 %s217_s9, 4  ;;  %s1306_s10 = int_to_ptr.vmem [resolvable:$true] %s227_s10 }
  0x14   : > { %s1309_s12 = scalar_lea.sflag [#allocation7], %s213_s29  ;;  %s1034_s13 = scalar_lea.hbm %s1304_s8, 256 }
  0x15   : > { %p1035_p10 = scmp.ne.s32.totalorder %s1304_s8, %s1034_s13  ;;  %p1315_p11 = pneg %p1294_p9 }
  0x16   : > { %s1039_s24 = scalar_lea.hbm %s1513_s1, 512  ;;  %p1040_p0 = scmp.lt.u32.totalorder %s1304_s8, %s1513_s1 }
  0x17   : > { %p1037_p12 = pnand %p1315_p11, %p1035_p10  ;;  %p1041_p1 = scmp.lt.u32.totalorder %s1039_s24, %s1034_s13 }
  0x18   : > { %p1043_p3 = scmp.lt.u32.totalorder %s1034_s13, %s1304_s8 }
  0x19   : > { %p1038_p13 = pneg %p1037_p12  ;;  %p1042_p2 = por %p1041_p1, %p1040_p0 }
  0x1b   : > { %p1044_p4 = por %p1043_p3, %p1042_p2 }
  0x1d   : > { %p1045_p5 = pnand %p1044_p4, %p1038_p13 }
  0x1f   : > { %1048 = shalt.err (!%p1045_p5)
}
  0x20   : > { %s1049_s29 = scalar_lea.vmem %s1306_s10, 256  ;;  %s1210_s6 = smov [#allocation6]  }
  0x21   : > { %p1050_p6 = scmp.ne.s32.totalorder %s1306_s10, %s1049_s29  ;;  %s1054_s7 = sshll.u32 %s1210_s6, 4  ;;  %s1055_s7 = int_to_ptr.vmem [resolvable:$false] %s1054_s7 }
  0x22   : > { %s1056_s9 = scalar_lea.vmem %s1055_s7, 512  ;;  %p1057_p12 = scmp.lt.s32.totalorder %s1306_s10, %s1055_s7 }
  0x23   : > { %p1052_p8 = pnand %p1050_p6, %p1315_p11  ;;  %p1058_p7 = scmp.lt.s32.totalorder %s1056_s9, %s1049_s29 }
  0x25   : > { %p1053_p10 = pneg %p1052_p8  ;;  %p1059_p0 = por %p1058_p7, %p1057_p12 }
  0x27   : > { %p1060_p1 = pnand %p1059_p0, %p1053_p10 }
  0x29   : > { %1063 = shalt.err (!%p1060_p1)
}
  0x2a   : > { %944 = dma.hbm_to_vmem [thread:$0]  (!%p1294_p9), %s1304_s8, 256, %s1306_s10, %s1309_s12  }
  0x2b   : > { %p839_p13 = scmp.ge.s32.totalorder %s1208_s20, 1  ;;  %p253_p2 = scmp.lt.s32.totalorder %s1208_s20, 3 }
  0x2c   : > { %s830_s15 = sshll.u32 %s1292_s27, 5  ;;  %s881_s23 = sshll.u32 %s1204_s19, 9 }
  0x2d   : > { %p1341_p3 = pnand %p839_p13, %p253_p2  ;;  %s1350_s5 = scalar_lea.hbm %s1512_s0, %s881_s23 }
  0x2e   : > { %s196_s29 = scalar_lea.vmem [#allocation3], %s830_s15  ;;  %s883_s8 = sshll.u32 %s1204_s19, 12 }
  0x2f   : > { %s1521_s13 = scalar_select %p1341_p3, 1, 0 }
  0x30   : > { %s206_s6 = sshll.u32 %s196_s29, 4  ;;  %s193_s10 = scalar_lea.sflag [#allocation4], %s1292_s27  ;;  %s1352_s6 = int_to_ptr.vmem [resolvable:$true] %s206_s6 }
  0x31   : > { %s1064_s7 = scalar_lea.hbm %s1350_s5, 512  ;;  %s1069_s23 = scalar_lea.hbm %s1512_s0, 1024 }
  0x32   : > { %p1065_p7 = scmp.ne.s32.totalorder %s1350_s5, %s1064_s7  ;;  %p1070_p6 = scmp.lt.u32.totalorder %s1350_s5, %s1512_s0 }
  0x33   : > { %p1071_p8 = scmp.lt.u32.totalorder %s1069_s23, %s1064_s7  ;;  %p1073_p12 = scmp.lt.u32.totalorder %s1064_s7, %s1350_s5 }
  0x34   : > { %p1067_p4 = pnand %p1065_p7, %p1315_p11 }
  0x35   : > { %p1072_p10 = por %p1071_p8, %p1070_p6 }
  0x36   : > { %p1068_p5 = pneg %p1067_p4 }
  0x37   : > { %p1074_p0 = por %p1073_p12, %p1072_p10 }
  0x39   : > { %p1075_p1 = pnand %p1074_p0, %p1068_p5 }
  0x3b   : > { %1078 = shalt.err (!%p1075_p1)
}
  0x3c   : > { %s1079_s15 = scalar_lea.vmem %s1352_s6, 512  ;;  %s1211_s11 = smov [#allocation3]  }
  0x3d   : > { %p1080_p13 = scmp.ne.s32.totalorder %s1352_s6, %s1079_s15  ;;  %s1084_s29 = sshll.u32 %s1211_s11, 4  ;;  %s1085_s29 = int_to_ptr.vmem [resolvable:$false] %s1084_s29 }
  0x3e   : > { %s1086_s9 = scalar_lea.vmem %s1085_s29, 1024  ;;  %p1087_p4 = scmp.lt.s32.totalorder %s1352_s6, %s1085_s29 }
  0x3f   : > { %p1082_p2 = pnand %p1080_p13, %p1315_p11  ;;  %p1088_p3 = scmp.lt.s32.totalorder %s1086_s9, %s1079_s15 }
  0x41   : > { %p1083_p7 = pneg %p1082_p2  ;;  %p1089_p6 = por %p1088_p3, %p1087_p4 }
  0x43   : > { %p1090_p8 = pnand %p1089_p6, %p1083_p7 }
  0x45   : > { %1093 = shalt.err (!%p1090_p8)
}
  0x46   : > { %941 = dma.hbm_to_vmem [thread:$0]  (!%p1294_p9), %s1350_s5, 512, %s1352_s6, %s193_s10  }
  0x47   : > { %s1382_s24 = scalar_lea.hbm %s1514_s2, %s883_s8  ;;  %s1522_s30 = sshll.u32 %s1292_s27, 8 }
  0x48   : > { %s238_s15 = scalar_lea.vmem [#allocation8], %s1522_s30  ;;  %s1094_s29 = scalar_lea.hbm %s1382_s24, 4096 }
  0x49   : > { %s245_s11 = sshll.u32 %s238_s15, 4  ;;  %p1095_p3 = scmp.ne.s32.totalorder %s1382_s24, %s1094_s29  ;;  %s1386_s11 = int_to_ptr.vmem [resolvable:$true] %s245_s11 }
  0x4a   : > { %s1099_s10 = scalar_lea.hbm %s1514_s2, 8192  ;;  %p1100_p12 = scmp.lt.u32.totalorder %s1382_s24, %s1514_s2 }
  0x4b   : > { %p1097_p5 = pnand %p1095_p3, %p1315_p11  ;;  %p1101_p0 = scmp.lt.u32.totalorder %s1099_s10, %s1094_s29 }
  0x4c   : > { %p1103_p13 = scmp.lt.u32.totalorder %s1094_s29, %s1382_s24 }
  0x4d   : > { %p1098_p10 = pneg %p1097_p5  ;;  %p1102_p1 = por %p1101_p0, %p1100_p12 }
  0x4f   : > { %p1104_p2 = por %p1103_p13, %p1102_p1 }
  0x51   : > { %p1105_p7 = pnand %p1104_p2, %p1098_p10 }
  0x53   : > { %1108 = shalt.err (!%p1105_p7)
}
  0x54   : > { %s1109_s27 = scalar_lea.vmem %s1386_s11, 4096  ;;  %s1212_s7 = smov [#allocation8]  }
  0x55   : > { %p1110_p4 = scmp.ne.s32.totalorder %s1386_s11, %s1109_s27  ;;  %s1114_s23 = sshll.u32 %s1212_s7, 4  ;;  %s1115_s23 = int_to_ptr.vmem [resolvable:$false] %s1114_s23 }
  0x56   : > { %s1116_s30 = scalar_lea.vmem %s1115_s23, 8192  ;;  %p1117_p3 = scmp.lt.s32.totalorder %s1386_s11, %s1115_s23 }
  0x57   : > { %p1112_p6 = pnand %p1110_p4, %p1315_p11  ;;  %p1118_p5 = scmp.lt.s32.totalorder %s1116_s30, %s1109_s27 }
  0x59   : > { %p1113_p8 = pneg %p1112_p6  ;;  %p1119_p12 = por %p1118_p5, %p1117_p3 }
  0x5b   : > { %p1120_p0 = pnand %p1119_p12, %p1113_p8 }
  0x5d   : > { %1123 = shalt.err (!%p1120_p0)
}
  0x5e   : > { %s1213_s15 = smov 64   ;;  %s1214_s29 = smov 4  }
  0x5f   : > { %947 = dma.hbm_to_vmem [thread:$0]  (!%p1294_p9), %s1382_s24, 4096, %s1386_s11, %s1309_s12, %s1213_s15, %s1213_s15, %s1214_s29  }
  0x60   : > { %p1523_p11 = scmp.ne.s32.totalorder %s1521_s13, 0 }
  0x61   : > { %s259_s14 = sand.u32 (!%p1523_p11), 1, %s1192_s16   ;;  %p1524_p10 = scmp.ne.s32.totalorder (!%p1523_p11), %s1518_s25, 0 }
  0x62   : > { %257 = sbr.rel (%p1523_p11) target bundleno = 406 (0x196), region = 36  ;;  %s840_s5 = sshll.u32 (!%p1523_p11), %s259_s14, 5 }
  0x63   : > { %s260_s6 = scalar_lea.sflag (!%p1523_p11), [#allocation4], %s259_s14  ;;  %s1413_s10 = scalar_lea.vmem (!%p1523_p11), [#allocation3], %s840_s5 }
  0x69   : > { %1175 = dma.done.wait (%p1524_p10), %s260_s6, 512  }
  0x6a   : > { %1177 = vsyncadd (%p1524_p10), %s260_s6, 4294966784  ;;  %s268_s8 = sand.u32 1, %s1270_s21   ;;  %s841_s28 = sshll.u32 %s259_s14, 4 }
  0x6b   : > { %s269_s12 = scalar_lea.sflag [#allocation7], %s268_s8  ;;  %s1420_s24 = scalar_lea.vmem [#allocation6], %s841_s28 }
  0x6c   : > { %1179 = dma.done.wait (%p1524_p10), %s269_s12, 4352  }
  0x6d   : > { %1181 = vsyncadd (%p1524_p10), %s269_s12, 4294962944  ;;  %s842_s13 = sshll.u32 %s259_s14, 8  ;;  %p843_p9 = scmp.ne.s32.totalorder %s1200_s18, 0 }
  0x6e   : > { %s1426_s11 = scalar_lea.vmem [#allocation8], %s842_s13  ;;  %v327_v0 = vld [vmem:[%s1515_s3] sm:$0xff] (!%p843_p9) }
  0x6f   : > { %326 = sbr.rel (%p843_p9) target bundleno = 118 (0x76), region = 52  ;;  %328 = vst [vmem:[#allocation2] sm:$0xff] (!%p843_p9), %v327_v0 }
  0x76 PF: > { %v1002_v1 = vld [vmem:[%s1426_s11 + $0x40] sm:$0xff]   ;;  %v1006_v5 = vld [vmem:[%s1426_s11 + $0x48] sm:$0xff]   ;;  %v1010_v9 = vld [vmem:[%s1426_s11 + $0x50] sm:$0xff]   ;;  %p876_p1 = scmp.ne.s32.totalorder %s1200_s18, 1 }
  0x77   : > { %v1003_v2 = vld [vmem:[%s1426_s11 + $0xc0] sm:$0xff]   ;;  %884 = vmatprep.subr.bf16.mxu0 %v1002_v1  ;;  %v1007_v6 = vld [vmem:[%s1426_s11 + $0xc8] sm:$0xff]   ;;  %v1011_v10 = vld [vmem:[%s1426_s11 + $0xd0] sm:$0xff]  }
  0x78   : > { %v1004_v3 = vld [vmem:[%s1426_s11] sm:$0xff]   ;;  %906 = vmatprep.subr.bf16.mxu1 %v1003_v2  ;;  %v1008_v7 = vld [vmem:[%s1426_s11 + $0x8] sm:$0xff]   ;;  %v1012_v11 = vld [vmem:[%s1426_s11 + $0x10] sm:$0xff]  }
  0x79   : > { %v1005_v4 = vld [vmem:[%s1426_s11 + $0x80] sm:$0xff]   ;;  %885 = vmatpush3.bf16.msra.mxu0 %v1004_v3  ;;  %v1009_v8 = vld [vmem:[%s1426_s11 + $0x88] sm:$0xff]   ;;  %v1013_v12 = vld [vmem:[%s1426_s11 + $0x90] sm:$0xff]  }
  0x7a   : > { %907 = vmatpush3.bf16.msra.mxu1 %v1005_v4  ;;  %886 = vmatprep.subr.bf16.mxu0 %v1006_v5  ;;  %v1014_v13 = vld [vmem:[%s1426_s11 + $0x58] sm:$0xff]   ;;  %v1018_v17 = vld [vmem:[%s1426_s11 + $0x60] sm:$0xff]   ;;  %v1022_v21 = vld [vmem:[%s1426_s11 + $0x68] sm:$0xff]  }
  0x7b   : > { %908 = vmatprep.subr.bf16.mxu1 %v1007_v6  ;;  %v1015_v14 = vld [vmem:[%s1426_s11 + $0xd8] sm:$0xff]   ;;  %v1019_v18 = vld [vmem:[%s1426_s11 + $0xe0] sm:$0xff]   ;;  %v1023_v22 = vld [vmem:[%s1426_s11 + $0xe8] sm:$0xff]  }
  0x7c   : > { %v1016_v15 = vld [vmem:[%s1426_s11 + $0x18] sm:$0xff]   ;;  %v1020_v19 = vld [vmem:[%s1426_s11 + $0x20] sm:$0xff]   ;;  %v1024_v23 = vld [vmem:[%s1426_s11 + $0x28] sm:$0xff]  }
  0x7d   : > { %887 = vmatpush3.bf16.msra.mxu0 %v1008_v7  ;;  %v1017_v16 = vld [vmem:[%s1426_s11 + $0x98] sm:$0xff]   ;;  %v1021_v20 = vld [vmem:[%s1426_s11 + $0xa0] sm:$0xff]   ;;  %v1025_v24 = vld [vmem:[%s1426_s11 + $0xa8] sm:$0xff]  }
  0x7e   : > { %909 = vmatpush3.bf16.msra.mxu1 %v1009_v8  ;;  %888 = vmatprep.subr.bf16.mxu0 %v1010_v9  ;;  %v1026_v25 = vld [vmem:[%s1426_s11 + $0x70] sm:$0xff]   ;;  %v1030_v29 = vld [vmem:[%s1426_s11 + $0x78] sm:$0xff]   ;;  %v330_v33 = vld [vmem:[%s1413_s10 + $0x8] sm:$0xff] }
  0x7f   : > { %910 = vmatprep.subr.bf16.mxu1 %v1011_v10  ;;  %v1027_v26 = vld [vmem:[%s1426_s11 + $0xf0] sm:$0xff]   ;;  %v1031_v30 = vld [vmem:[%s1426_s11 + $0xf8] sm:$0xff]   ;;  %v329_v39 = vld [vmem:[%s1413_s10] sm:$0xff] }
  0x80   : > { %v1028_v27 = vld [vmem:[%s1426_s11 + $0x30] sm:$0xff]   ;;  %v1032_v31 = vld [vmem:[%s1426_s11 + $0x38] sm:$0xff]  }
  0x81   : > { %889 = vmatpush3.bf16.msra.mxu0 %v1012_v11  ;;  %v1029_v28 = vld [vmem:[%s1426_s11 + $0xb0] sm:$0xff]   ;;  %v1033_v32 = vld [vmem:[%s1426_s11 + $0xb8] sm:$0xff]  }
  0x82   : > { %911 = vmatpush3.bf16.msra.mxu1 %v1013_v12  ;;  %890 = vmatprep.subr.bf16.mxu0 %v1014_v13  ;;  %v333_v34 = vld [vmem:[%s1420_s24] sm:$0xff]  ;;  %v332_v35 = vld [vmem:[%s1413_s10 + $0x18] sm:$0xff] }
  0x83   : > { %912 = vmatprep.subr.bf16.mxu1 %v1015_v14  ;;  %v335_v36 = vunpack.c.l.bf16 %v333_v34  ;;  %v336_v37 = vunpack.c.h.bf16 %v333_v34  ;;  %v334_v38 = vld [vmem:[%s1420_s24 + $0x8] sm:$0xff]  ;;  %v331_v40 = vld [vmem:[%s1413_s10 + $0x10] sm:$0xff] }
  0x84   : > { %v337_v41 = vunpack.c.l.bf16 %v334_v38  ;;  %v338_v42 = vunpack.c.h.bf16 %v334_v38  ;;  %v347_v60 = vld [vmem:[#allocation2] sm:$0xff] }
  0x85   : > { %891 = vmatpush3.bf16.msra.mxu0 %v1016_v15  ;;  %v340_v43 = vmul.f32 %v336_v37, %v330_v33  ;;  %v339_v44 = vmul.f32 %v335_v36, %v329_v39 }
  0x86   : > { %913 = vmatpush3.bf16.msra.mxu1 %v1017_v16  ;;  %892 = vmatprep.subr.bf16.mxu0 %v1018_v17  ;;  %v342_v45 = vmul.f32 %v338_v42, %v332_v35  ;;  %v341_v46 = vmul.f32 %v337_v41, %v331_v40 }
  0x87   : > { %914 = vmatprep.subr.bf16.mxu1 %v1019_v18  ;;  %v344_v47 = vpack.c.bf16 %v340_v43, %v340_v43  ;;  %v343_v48 = vpack.c.bf16 %v339_v44, %v339_v44 }
  0x88   : > { %v346_v49 = vpack.c.bf16 %v342_v45, %v342_v45  ;;  %v345_v50 = vpack.c.bf16 %v341_v46, %v341_v46 }
  0x89   : > { %893 = vmatpush3.bf16.msra.mxu0 %v1020_v19  ;;  %636 = vmatprep.mubr.bf16.mxu0 %v344_v47 }
  0x8a   : > { %915 = vmatpush3.bf16.msra.mxu1 %v1021_v20  ;;  %894 = vmatprep.subr.bf16.mxu0 %v1022_v21 }
  0x8b   : > { %916 = vmatprep.subr.bf16.mxu1 %v1023_v22  ;;  %676 = vmatprep.mubr.bf16.mxu1 %v346_v49 }
  0x8d   : > { %895 = vmatpush3.bf16.msra.mxu0 %v1024_v23 }
  0x8e   : > { %917 = vmatpush3.bf16.msra.mxu1 %v1025_v24  ;;  %896 = vmatprep.subr.bf16.mxu0 %v1026_v25 }
  0x8f   : > { %918 = vmatprep.subr.bf16.mxu1 %v1027_v26 }
  0x91   : > { %897 = vmatpush3.bf16.msra.mxu0 %v1028_v27 }
  0x92   : > { %919 = vmatpush3.bf16.msra.mxu1 %v1029_v28  ;;  %898 = vmatprep.subr.bf16.mxu0 %v1030_v29 }
  0x93   : > { %920 = vmatprep.subr.bf16.mxu1 %v1031_v30 }
  0x95   : > { %899 = vmatpush3.bf16.msra.mxu0 %v1032_v31 }
  0x96   : > { %921 = vmatpush3.bf16.msra.mxu1 %v1033_v32 }
  0x98   : > { %637 = vmatmul.mubr.bf16.vlgmr.msra.gmra.mrb[0].mxu0 %v343_v48 }
  0x99   : > { %677 = vmatmul.mubr.bf16.vlgmr.msra.gmra.mrb[0].mxu1 %v345_v50 }
 0x16b   : > { %v900_v51 = vpop.f32.mrb[0].mxu0 }
 0x16c   : > { %v922_v52 = vpop.f32.mrb[0].mxu1  ;;  %v901_v53 = vpop.f32.mrb[1].mxu0 }
 0x16d   : > { %v902_v54 = vadd.f32 %v901_v53, %v900_v51  ;;  %v923_v55 = vpop.f32.mrb[1].mxu1  ;;  %v903_v56 = vpop.f32.mrb[2].mxu0 }
 0x16e   : > { %v924_v57 = vadd.f32 %v923_v55, %v922_v52  ;;  %v925_v58 = vpop.f32.mrb[2].mxu1  ;;  %v904_v59 = vpop.f32.mrb[3].mxu0  ;;  %689 = sbr.rel (%p876_p1) target bundleno = 381 (0x17d), region = 56 }
 0x16f   : > { %v926_v61 = vpop.f32.mrb[3].mxu1 }
 0x170   : > { %v679_v62 = vadd.f32 %v924_v57, %v902_v54 }
 0x172   : > { %v684_v63 = vadd.f32 %v679_v62, %v347_v60 }
 0x174   : > { %685 = vst [vmem:[#allocation2] sm:$0xff] %v684_v63 }
 0x17b   : > { %v690_v0 = vld [vmem:[#allocation2] sm:$0xff] }
 0x17c   : > { %691 = vst [vmem:[#allocation9] sm:$0xff] %v690_v0 }
 0x17d PF: > { %p949_p13 = scmp.eq.s32.totalorder %s1270_s21, 1  ;;  %s1215_s25 = smov [#allocation9]  }
 0x17e   : > { %s701_s7 = sshll.u32 %s1215_s25, 4  ;;  %s702_s7 = int_to_ptr.vmem [resolvable:$true] %s701_s7 }
 0x17f   : > { %s1124_s23 = scalar_lea.vmem %s702_s7, 128  ;;  %p1131_p6 = scmp.lt.s32.totalorder %s702_s7, %s702_s7 }
 0x180   : > { %p1125_p2 = scmp.ne.s32.totalorder %s702_s7, %s1124_s23  ;;  %p1132_p8 = scmp.lt.s32.totalorder %s1124_s23, %s1124_s23 }
 0x182   : > { %p1126_p7 = pnand %p1125_p2, %p949_p13  ;;  %p1133_p3 = por %p1132_p8, %p1131_p6 }
 0x184   : > { %p1127_p4 = pneg %p1126_p7 }
 0x186   : > { %p1134_p5 = pnand %p1133_p3, %p1127_p4 }
 0x188   : > { %1137 = shalt.err (!%p1134_p5)
}
 0x189   : > { %s1138_s15 = scalar_lea.hbm %s1516_s4, 128 }
 0x18a   : > { %p1139_p12 = scmp.ne.s32.totalorder %s1516_s4, %s1138_s15  ;;  %p1144_p10 = scmp.lt.u32.totalorder %s1138_s15, %s1516_s4 }
 0x18c   : > { %p1140_p0 = pnand %p1139_p12, %p949_p13 }
 0x18e   : > { %p1141_p11 = pneg %p1140_p0 }
 0x190   : > { %p1146_p9 = pnand %p1144_p10, %p1141_p11 }
 0x192   : > { %1149 = shalt.err (!%p1146_p9)
}
 0x193   : > { %935 = dma.vmem_to_hbm [thread:$0]  (%p949_p13), %s702_s7, 128, %s1516_s4, [#allocation5]  }
 0x194   : > { %1183 = dma.done.wait (%p949_p13), [#allocation5], 128  }
 0x195   : > { %1185 = vsyncadd (%p949_p13), [#allocation5], 4294967168 }
 0x196 PF: > { %s21_s20 = sadd.s32 1, %s1208_s20   ;;  %s1525_s15 = smov %s1192_s16 }
 0x197   : > { %p18_p1 = scmp.ge.s32.totalorder %s21_s20, 4   ;;  %s1526_s16 = smov %s1196_s17 }
 0x198   : > { %s1527_s17 = smov %s1289_s26  ;;  %s1528_s18 = smov %s1204_s19 }
 0x199   : > { %s1529_s19 = smov %s1531_s22  ;;  %20 = sbr.rel (!%p18_p1) target bundleno = 7 (0x7), region = 109 }
 0x1a0   :  { %714 = vsyncpa [#allocation4], 1 }
 0x1a1   :  { %716 = vsyncpa [#allocation4 + $0x1], 1 }
 0x1a2   :  { %717 = vsyncpa [#allocation7], 1 }
 0x1a3   :  { %719 = vsyncpa [#allocation7 + $0x1], 1 }
 0x1a4   :  { %720 = vsyncpa [#allocation5], 1 }
 0x1a5   :  { %722 = vsyncpa [#allocation5 + $0x1], 1 }

</bundles_post_ra>
